<compile_context>
chip_gen: v7x
topology: tpu7x:2x2x1
jax: 0.10.0
libtpu: 0.0.40
codegen_flags: <defaults>
</compile_context>

<pallas_src>
import functools

import jax
import jax.numpy as jnp
from jax.experimental import pallas as pl
from jax.experimental.pallas import tpu as pltpu

NEG_SLOPE = 0.2
BN_EPS = 1e-5

IN_FEATURES = 1080
DIMS = [32, 32, 16]
OUT_FEATURES = 2
W_PACK_ROWS = 56        # W2 rows 0:32, W3 rows 32:48, W4 rows 48:50 (8-aligned starts)
_K_LANES = 1152         # internal lane-padded width of 1080 (VMEM sizing estimate only)


def _round_up(v, m):
    return (v + m - 1) // m * m


def _vmem_capacity_bytes():
    """Per-generation VMEM capacity; conservative (v7x) fallback if unknown."""
    try:
        cap = getattr(pltpu.get_tpu_info(), "vmem_capacity_bytes", None)
        if cap:
            return int(cap)
    except Exception:
        pass
    return 64 << 20


# --------------------------------------------------------------------------- #
# Kernel bodies
# --------------------------------------------------------------------------- #
def _head_math(h, wp_ref, v_ref, n_true):
    """BN1+LReLU on the layer-1 pre-activation, then layers 2-4.

    h      : (32, B_pad) feature-major layer-1 pre-activation (batch on lanes)
    wp_ref : (56, 32)    W2 rows 0:32, W3 rows 32:48, W4 rows 48:50 (cols 0:16)
    v_ref  : (32, 8)     lane columns: g1 be1 g2 be2 g3 be3 b4 -
    n_true : python int, true (unpadded) batch size
    """
    d1, d2, d3, d4 = DIMS[0], DIMS[1], DIMS[2], OUT_FEATURES
    b_pad = h.shape[1]
    inv_n = jnp.float32(1.0 / n_true)
    lane = jax.lax.broadcasted_iota(jnp.int32, (1, b_pad), 1)
    mask = (lane < n_true).astype(jnp.float32)      # exclude zero pad lanes from stats

    def bn_lrelu(z, g, be):
        # BatchNorm1d training semantics: batch mean / biased batch variance over
        # the lane (batch) axis, gamma folded into the rsqrt scale, then LeakyReLU.
        mean = jnp.sum(z * mask, axis=1, keepdims=True) * inv_n
        diff = z - mean
        var = jnp.sum(jnp.square(diff) * mask, axis=1, keepdims=True) * inv_n
        scale = g * jax.lax.rsqrt(var + BN_EPS)
        zn = diff * scale + be
        return jnp.where(zn >= 0.0, zn, NEG_SLOPE * zn)

    # b1..b3 are mathematically dead under training-mode BN (mean subtraction).
    h = bn_lrelu(h, v_ref[:, 0:1], v_ref[:, 1:2])
    h = jnp.dot(wp_ref[0:d2, 0:d1], h, preferred_element_type=jnp.float32)
    h = bn_lrelu(h, v_ref[0:d2, 2:3], v_ref[0:d2, 3:4])
    h = jnp.dot(wp_ref[32:32 + d3, 0:d2], h, preferred_element_type=jnp.float32)
    h = bn_lrelu(h, v_ref[0:d3, 4:5], v_ref[0:d3, 5:6])
    y = jnp.dot(wp_ref[48:48 + d4, 0:d3], h, preferred_element_type=jnp.float32)
    return y + v_ref[0:d4, 6:7]


def _fused_kernel(x_ref, w1_ref, wp_ref, v_ref, out_ref, *, n_true):
    """Whole MLP in one invocation (batch fits in VMEM). x stays (B_pad, 1080)."""
    # Transposed-RHS contraction: (32,1080) . (B_pad,1080)^T -> (32, B_pad),
    # keeping batch on the lane axis without a materialized transpose of x.
    h = jax.lax.dot_general(
        w1_ref[...], x_ref[...],
        dimension_numbers=(((1,), (1,)), ((), ())),
        preferred_element_type=jnp.float32)
    out_ref[...] = _head_math(h, wp_ref, v_ref, n_true)


def _layer1_kernel(x_ref, w1_ref, h_ref):
    """One batch tile of layer 1: (32,1080) . (TB,1080)^T -> (32, TB)."""
    h_ref[...] = jax.lax.dot_general(
        w1_ref[...], x_ref[...],
        dimension_numbers=(((1,), (1,)), ((), ())),
        preferred_element_type=jnp.float32)


def _head_kernel(h_ref, wp_ref, v_ref, out_ref, *, n_true):
    """Global-batch BN statistics + layers 2-4 on the tiny (32, B_pad) tensor."""
    out_ref[...] = _head_math(h_ref[...], wp_ref, v_ref, n_true)


# --------------------------------------------------------------------------- #
# Parameter packing and wrapper
# --------------------------------------------------------------------------- #
def pack_params(params):
    """One-time packing of PyTorch-layout params into 3 kernel arrays."""
    d1, d2, d3, d4 = DIMS[0], DIMS[1], DIMS[2], OUT_FEATURES
    w1 = params["w1"].astype(jnp.float32)                       # (32, 1080), (out, in)
    w_pack = jnp.zeros((W_PACK_ROWS, d1), jnp.float32)
    w_pack = w_pack.at[0:d2, 0:d1].set(params["w2"])
    w_pack = w_pack.at[32:32 + d3, 0:d2].set(params["w3"])
    w_pack = w_pack.at[48:48 + d4, 0:d3].set(params["w4"])
    v_pack = jnp.zeros((d1, 8), jnp.float32)
    v_pack = v_pack.at[0:d1, 0].set(params["g1"])
    v_pack = v_pack.at[0:d1, 1].set(params["be1"])
    v_pack = v_pack.at[0:d2, 2].set(params["g2"])
    v_pack = v_pack.at[0:d2, 3].set(params["be2"])
    v_pack = v_pack.at[0:d3, 4].set(params["g3"])
    v_pack = v_pack.at[0:d3, 5].set(params["be3"])
    v_pack = v_pack.at[0:d4, 6].set(params["b4"])
    return {"w1": w1, "w_pack": w_pack, "v_pack": v_pack}


def linear_policy_bn_shallow(x, packed, tb=None):
    """Returns (angle, throttle), each of shape (B,)."""
    b = x.shape[0]
    assert x.shape[1] == IN_FEATURES
    x = x.astype(jnp.float32)
    d1 = DIMS[0]
    small_flops = 2 * (d1 * DIMS[1] + DIMS[1] * DIMS[2] + DIMS[2] * OUT_FEATURES)

    vmem_cap = _vmem_capacity_bytes()
    big_vmem = vmem_cap >= (100 << 20)              # v5e/v6e: 128 MiB; v7x: 64 MiB
    vmem_ceiling = (112 << 20) if big_vmem else (48 << 20)
    if tb is None:
        tb = 4096 if big_vmem else 2048             # per-generation batch tile

    vmem_spec = pl.BlockSpec(memory_space=pltpu.MemorySpace.VMEM)

    if b <= tb:
        # ---- Small/medium batch: one fused kernel, single dispatch. ----
        b_pad = _round_up(b, 8)
        if b_pad != b:
            x = jnp.pad(x, ((0, b_pad - b), (0, 0)))   # pad lanes masked out of BN stats
        need = 4 * ((b_pad + d1) * _K_LANES + (d1 + OUT_FEATURES) * b_pad) + (2 << 20)
        vmem_limit = int(min(max(need * 3 // 2, 4 << 20), vmem_ceiling))
        y = pl.pallas_call(
            functools.partial(_fused_kernel, n_true=b),
            out_shape=jax.ShapeDtypeStruct((OUT_FEATURES, b_pad), jnp.float32),
            in_specs=[vmem_spec] * 4,
            out_specs=vmem_spec,
            compiler_params=pltpu.CompilerParams(vmem_limit_bytes=vmem_limit),
            cost_estimate=pl.CostEstimate(
                flops=b_pad * (2 * IN_FEATURES * d1 + small_flops),
                transcendentals=sum(DIMS),
                bytes_accessed=4 * ((b_pad + d1) * IN_FEATURES + OUT_FEATURES * b_pad)),
        )(x, packed["w1"], packed["w_pack"], packed["v_pack"])
    else:
        # ---- Large batch: tiled layer-1 pass + single head pass (exact BN). ----
        num_tiles = -(-b // tb)
        if num_tiles > 1 and tb % 128 != 0:
            raise ValueError("tb must be a multiple of 128 when the batch is tiled")
        b_pad = num_tiles * tb
        if b_pad != b:
            x = jnp.pad(x, ((0, b_pad - b), (0, 0)))   # pad lanes masked out of BN stats

        need1 = 4 * (2 * tb * _K_LANES + 2 * d1 * _K_LANES + 2 * d1 * tb) + (2 << 20)
        vmem1 = int(min(max(need1 * 6 // 5, 4 << 20), vmem_ceiling))
        h1 = pl.pallas_call(
            _layer1_kernel,
            out_shape=jax.ShapeDtypeStruct((d1, b_pad), jnp.float32),
            grid_spec=pltpu.PrefetchScalarGridSpec(
                num_scalar_prefetch=0,
                grid=(num_tiles,),
                in_specs=[pl.BlockSpec((tb, IN_FEATURES), lambda i: (i, 0)),
                          pl.BlockSpec((d1, IN_FEATURES), lambda i: (0, 0))],
                out_specs=pl.BlockSpec((d1, tb), lambda i: (0, i))),
            compiler_params=pltpu.CompilerParams(
                dimension_semantics=("parallel",),   # v7x: split batch tiles over both TCs
                vmem_limit_bytes=vmem1),
            cost_estimate=pl.CostEstimate(
                flops=2 * b_pad * IN_FEATURES * d1,
                transcendentals=0,
                bytes_accessed=4 * ((b_pad + d1) * IN_FEATURES + d1 * b_pad)),
        )(x, packed["w1"])

        # TODO(synk): for extreme batches where 32*B f32 exceeds VMEM, the head pass
        # would need its own batch grid with accumulated BN statistics per layer.
        need2 = 4 * ((d1 + OUT_FEATURES) * b_pad + 1024) + (2 << 20)
        vmem2 = int(min(max(need2 * 3 // 2, 4 << 20), vmem_ceiling))
        y = pl.pallas_call(
            functools.partial(_head_kernel, n_true=b),
            out_shape=jax.ShapeDtypeStruct((OUT_FEATURES, b_pad), jnp.float32),
            in_specs=[vmem_spec] * 3,
            out_specs=vmem_spec,
            compiler_params=pltpu.CompilerParams(vmem_limit_bytes=vmem2),
            cost_estimate=pl.CostEstimate(
                flops=b_pad * small_flops,
                transcendentals=sum(DIMS),
                bytes_accessed=4 * (d1 + OUT_FEATURES) * b_pad),
        )(h1, packed["w_pack"], packed["v_pack"])

    angle, throttle = y[0, :b], y[1, :b]
    return angle, throttle


# --------------------------------------------------------------------------- #
# Deterministic synthetic params + pure-JAX reference (full original semantics)
# --------------------------------------------------------------------------- #
def init_params(key):
    """Deterministic synthetic parameters in PyTorch nn.Linear layout."""
    dims_in = [IN_FEATURES, DIMS[0], DIMS[1], DIMS[2]]
    dims_out = [DIMS[0], DIMS[1], DIMS[2], OUT_FEATURES]
    params = {}
    keys = jax.random.split(key, 2 * len(dims_in))
    for i, (din, dout) in enumerate(zip(dims_in, dims_out)):
        kw, kb = keys[2 * i], keys[2 * i + 1]
        scale = 1.0 / jnp.sqrt(jnp.float32(din))
        params[f"w{i + 1}"] = (
            jax.random.uniform(kw, (dout, din), jnp.float32, -1.0, 1.0) * scale)
        params[f"b{i + 1}"] = (
            jax.random.uniform(kb, (dout,), jnp.float32, -1.0, 1.0) * scale)
    bn_keys = jax.random.split(jax.random.fold_in(key, 1234), 2 * len(DIMS))
    for i, d in enumerate(DIMS):
        kg, kb = bn_keys[2 * i], bn_keys[2 * i + 1]
        params[f"g{i + 1}"] = 1.0 + 0.1 * jax.random.normal(kg, (d,), jnp.float32)
        params[f"be{i + 1}"] = 0.1 * jax.random.normal(kb, (d,), jnp.float32)
    return params


def _reference(x, params):
    """Pure-JAX reference with the FULL original semantics (incl. b1..b3)."""
    def lin(h, w, bvec):
        return h @ w.T + bvec

    def bn_lrelu(h, g, be):
        mean = jnp.mean(h, axis=0, keepdims=True)
        var = jnp.mean(jnp.square(h - mean), axis=0, keepdims=True)
        hn = (h - mean) * jax.lax.rsqrt(var + BN_EPS) * g + be
        return jnp.where(hn >= 0.0, hn, NEG_SLOPE * hn)

    h = bn_lrelu(lin(x, params["w1"], params["b1"]), params["g1"], params["be1"])
    h = bn_lrelu(lin(h, params["w2"], params["b2"]), params["g2"], params["be2"])
    h = bn_lrelu(lin(h, params["w3"], params["b3"]), params["g3"], params["be3"])
    y = lin(h, params["w4"], params["b4"])
    return y[:, 0], y[:, 1]


if __name__ == "__main__":
    key = jax.random.PRNGKey(0)
    k_x, k_p = jax.random.split(key)
    params = init_params(k_p)
    packed = pack_params(params)

    # 1) Shipped small-batch case (training-mode BatchNorm needs batch > 1).
    b1 = 8
    x1 = jax.random.normal(k_x, (b1, IN_FEATURES), jnp.float32)
    a1, t1 = linear_policy_bn_shallow(x1, packed)
    a1 = jax.block_until_ready(a1)
    t1 = jax.block_until_ready(t1)
    ra1, rt1 = _reference(x1, params)
    assert a1.shape == (b1,) and t1.shape == (b1,)
    assert jnp.allclose(a1, ra1, atol=2e-4, rtol=2e-4)
    assert jnp.allclose(t1, rt1, atol=2e-4, rtol=2e-4)

    # 2) Non-sublane-aligned batch: exercises the pad-lane masking of BN stats.
    b2 = 20
    x2 = jax.random.normal(jax.random.fold_in(k_x, 1), (b2, IN_FEATURES), jnp.float32)
    a2, t2 = linear_policy_bn_shallow(x2, packed)
    ra2, rt2 = _reference(x2, params)
    assert jnp.allclose(jax.block_until_ready(a2), ra2, atol=2e-4, rtol=2e-4)
    assert jnp.allclose(jax.block_until_ready(t2), rt2, atol=2e-4, rtol=2e-4)

    # 3) Batch-tiled path (forced small tile): exercises grid + two-pass BN structure.
    b3 = 300
    x3 = jax.random.normal(jax.random.fold_in(k_x, 2), (b3, IN_FEATURES), jnp.float32)
    a3, t3 = linear_policy_bn_shallow(x3, packed, tb=128)
    ra3, rt3 = _reference(x3, params)
    assert jnp.allclose(jax.block_until_ready(a3), ra3, atol=2e-4, rtol=2e-4)
    assert jnp.allclose(jax.block_until_ready(t3), rt3, atol=2e-4, rtol=2e-4)

    print("KERNEL_OK")
</pallas_src>

<mosaic_0001>
module attributes {stable_mosaic.version = 11 : i64} {
  func.func @_fused_kernel(%arg0: memref<8x1080xf32, #tpu.memory_space<vmem>>, %arg1: memref<32x1080xf32, #tpu.memory_space<vmem>>, %arg2: memref<56x32xf32, #tpu.memory_space<vmem>>, %arg3: memref<32x8xf32, #tpu.memory_space<vmem>>, %arg4: memref<2x8xf32, #tpu.memory_space<vmem>>) attributes {dimension_semantics = [], scalar_prefetch = 0 : i64, scratch_operands = 0 : i64, tpu.core_type = #tpu.core_type<tc>} {
    %c0 = arith.constant 0 : index
    %c0_0 = arith.constant 0 : index
    %0 = vector.load %arg1[%c0, %c0_0] : memref<32x1080xf32, #tpu.memory_space<vmem>>, vector<32x1080xf32>
    %c0_1 = arith.constant 0 : index
    %c0_2 = arith.constant 0 : index
    %1 = vector.load %arg0[%c0_1, %c0_2] : memref<8x1080xf32, #tpu.memory_space<vmem>>, vector<8x1080xf32>
    %cst = arith.constant dense<0.000000e+00> : vector<32x8xf32>
    %2 = tpu.matmul %0, %1, %cst {dimension_numbers = #tpu.dot_dimension_numbers<[1], [1], [0], [0], [0, 0, 1, 0], [], []>} : vector<32x1080xf32>, vector<8x1080xf32>, vector<32x8xf32> -> vector<32x8xf32>
    %3 = tpu.iota {dimensions = array<i32: 1>} : vector<1x8xi32>
    %c8_i32 = arith.constant 8 : i32
    %4 = vector.broadcast %c8_i32 : i32 to vector<1x8xi32>
    %5 = arith.cmpi slt, %3, %4 : vector<1x8xi32>
    %6 = arith.extui %5 : vector<1x8xi1> to vector<1x8xi32>
    %7 = arith.sitofp %6 : vector<1x8xi32> to vector<1x8xf32>
    %c0_3 = arith.constant 0 : index
    %c0_4 = arith.constant 0 : index
    %8 = vector.load %arg3[%c0_3, %c0_4] : memref<32x8xf32, #tpu.memory_space<vmem>>, vector<32x1xf32>
    %c0_5 = arith.constant 0 : index
    %c1 = arith.constant 1 : index
    %9 = vector.load %arg3[%c0_5, %c1] : memref<32x8xf32, #tpu.memory_space<vmem>>, vector<32x1xf32>
    %10 = vector.broadcast %7 : vector<1x8xf32> to vector<32x8xf32>
    %11 = arith.mulf %2, %10 : vector<32x8xf32>
    %cst_6 = arith.constant dense<0.000000e+00> : vector<32xf32>
    %12 = vector.multi_reduction <add>, %11, %cst_6 [1] : vector<32x8xf32> to vector<32xf32>
    %13 = vector.shape_cast %12 : vector<32xf32> to vector<32x1xf32>
    %cst_7 = arith.constant 1.250000e-01 : f32
    %14 = vector.broadcast %cst_7 : f32 to vector<32x1xf32>
    %15 = arith.mulf %13, %14 : vector<32x1xf32>
    %16 = vector.broadcast %15 : vector<32x1xf32> to vector<32x8xf32>
    %17 = arith.subf %2, %16 : vector<32x8xf32>
    %18 = arith.mulf %17, %17 : vector<32x8xf32>
    %19 = vector.broadcast %7 : vector<1x8xf32> to vector<32x8xf32>
    %20 = arith.mulf %18, %19 : vector<32x8xf32>
    %cst_8 = arith.constant dense<0.000000e+00> : vector<32xf32>
    %21 = vector.multi_reduction <add>, %20, %cst_8 [1] : vector<32x8xf32> to vector<32xf32>
    %22 = vector.shape_cast %21 : vector<32xf32> to vector<32x1xf32>
    %cst_9 = arith.constant 1.250000e-01 : f32
    %23 = vector.broadcast %cst_9 : f32 to vector<32x1xf32>
    %24 = arith.mulf %22, %23 : vector<32x1xf32>
    %cst_10 = arith.constant 9.99999974E-6 : f32
    %25 = vector.broadcast %cst_10 : f32 to vector<32x1xf32>
    %26 = arith.addf %24, %25 : vector<32x1xf32>
    %27 = math.rsqrt %26 : vector<32x1xf32>
    %28 = arith.mulf %8, %27 : vector<32x1xf32>
    %29 = vector.broadcast %28 : vector<32x1xf32> to vector<32x8xf32>
    %30 = arith.mulf %17, %29 : vector<32x8xf32>
    %31 = vector.broadcast %9 : vector<32x1xf32> to vector<32x8xf32>
    %32 = arith.addf %30, %31 : vector<32x8xf32>
    %cst_11 = arith.constant 0.000000e+00 : f32
    %33 = vector.broadcast %cst_11 : f32 to vector<32x8xf32>
    %34 = arith.cmpf oge, %32, %33 : vector<32x8xf32>
    %cst_12 = arith.constant 2.000000e-01 : f32
    %35 = vector.broadcast %cst_12 : f32 to vector<32x8xf32>
    %36 = arith.mulf %35, %32 : vector<32x8xf32>
    %37 = arith.select %34, %32, %36 : vector<32x8xi1>, vector<32x8xf32>
    %c0_13 = arith.constant 0 : index
    %c0_14 = arith.constant 0 : index
    %38 = vector.load %arg2[%c0_13, %c0_14] : memref<56x32xf32, #tpu.memory_space<vmem>>, vector<32x32xf32>
    %cst_15 = arith.constant dense<0.000000e+00> : vector<32x8xf32>
    %39 = tpu.matmul %38, %37, %cst_15 {dimension_numbers = #tpu.dot_dimension_numbers<[1], [0], [0], [1], [0, 0, 1, 1], [], []>} : vector<32x32xf32>, vector<32x8xf32>, vector<32x8xf32> -> vector<32x8xf32>
    %c0_16 = arith.constant 0 : index
    %c2 = arith.constant 2 : index
    %40 = vector.load %arg3[%c0_16, %c2] : memref<32x8xf32, #tpu.memory_space<vmem>>, vector<32x1xf32>
    %c0_17 = arith.constant 0 : index
    %c3 = arith.constant 3 : index
    %41 = vector.load %arg3[%c0_17, %c3] : memref<32x8xf32, #tpu.memory_space<vmem>>, vector<32x1xf32>
    %42 = vector.broadcast %7 : vector<1x8xf32> to vector<32x8xf32>
    %43 = arith.mulf %39, %42 : vector<32x8xf32>
    %cst_18 = arith.constant dense<0.000000e+00> : vector<32xf32>
    %44 = vector.multi_reduction <add>, %43, %cst_18 [1] : vector<32x8xf32> to vector<32xf32>
    %45 = vector.shape_cast %44 : vector<32xf32> to vector<32x1xf32>
    %cst_19 = arith.constant 1.250000e-01 : f32
    %46 = vector.broadcast %cst_19 : f32 to vector<32x1xf32>
    %47 = arith.mulf %45, %46 : vector<32x1xf32>
    %48 = vector.broadcast %47 : vector<32x1xf32> to vector<32x8xf32>
    %49 = arith.subf %39, %48 : vector<32x8xf32>
    %50 = arith.mulf %49, %49 : vector<32x8xf32>
    %51 = vector.broadcast %7 : vector<1x8xf32> to vector<32x8xf32>
    %52 = arith.mulf %50, %51 : vector<32x8xf32>
    %cst_20 = arith.constant dense<0.000000e+00> : vector<32xf32>
    %53 = vector.multi_reduction <add>, %52, %cst_20 [1] : vector<32x8xf32> to vector<32xf32>
    %54 = vector.shape_cast %53 : vector<32xf32> to vector<32x1xf32>
    %cst_21 = arith.constant 1.250000e-01 : f32
    %55 = vector.broadcast %cst_21 : f32 to vector<32x1xf32>
    %56 = arith.mulf %54, %55 : vector<32x1xf32>
    %cst_22 = arith.constant 9.99999974E-6 : f32
    %57 = vector.broadcast %cst_22 : f32 to vector<32x1xf32>
    %58 = arith.addf %56, %57 : vector<32x1xf32>
    %59 = math.rsqrt %58 : vector<32x1xf32>
    %60 = arith.mulf %40, %59 : vector<32x1xf32>
    %61 = vector.broadcast %60 : vector<32x1xf32> to vector<32x8xf32>
    %62 = arith.mulf %49, %61 : vector<32x8xf32>
    %63 = vector.broadcast %41 : vector<32x1xf32> to vector<32x8xf32>
    %64 = arith.addf %62, %63 : vector<32x8xf32>
    %cst_23 = arith.constant 0.000000e+00 : f32
    %65 = vector.broadcast %cst_23 : f32 to vector<32x8xf32>
    %66 = arith.cmpf oge, %64, %65 : vector<32x8xf32>
    %cst_24 = arith.constant 2.000000e-01 : f32
    %67 = vector.broadcast %cst_24 : f32 to vector<32x8xf32>
    %68 = arith.mulf %67, %64 : vector<32x8xf32>
    %69 = arith.select %66, %64, %68 : vector<32x8xi1>, vector<32x8xf32>
    %c32 = arith.constant 32 : index
    %c0_25 = arith.constant 0 : index
    %70 = vector.load %arg2[%c32, %c0_25] : memref<56x32xf32, #tpu.memory_space<vmem>>, vector<16x32xf32>
    %cst_26 = arith.constant dense<0.000000e+00> : vector<16x8xf32>
    %71 = tpu.matmul %70, %69, %cst_26 {dimension_numbers = #tpu.dot_dimension_numbers<[1], [0], [0], [1], [0, 0, 1, 1], [], []>} : vector<16x32xf32>, vector<32x8xf32>, vector<16x8xf32> -> vector<16x8xf32>
    %c0_27 = arith.constant 0 : index
    %c4 = arith.constant 4 : index
    %72 = vector.load %arg3[%c0_27, %c4] : memref<32x8xf32, #tpu.memory_space<vmem>>, vector<16x1xf32>
    %c0_28 = arith.constant 0 : index
    %c5 = arith.constant 5 : index
    %73 = vector.load %arg3[%c0_28, %c5] : memref<32x8xf32, #tpu.memory_space<vmem>>, vector<16x1xf32>
    %74 = vector.broadcast %7 : vector<1x8xf32> to vector<16x8xf32>
    %75 = arith.mulf %71, %74 : vector<16x8xf32>
    %cst_29 = arith.constant dense<0.000000e+00> : vector<16xf32>
    %76 = vector.multi_reduction <add>, %75, %cst_29 [1] : vector<16x8xf32> to vector<16xf32>
    %77 = vector.shape_cast %76 : vector<16xf32> to vector<16x1xf32>
    %cst_30 = arith.constant 1.250000e-01 : f32
    %78 = vector.broadcast %cst_30 : f32 to vector<16x1xf32>
    %79 = arith.mulf %77, %78 : vector<16x1xf32>
    %80 = vector.broadcast %79 : vector<16x1xf32> to vector<16x8xf32>
    %81 = arith.subf %71, %80 : vector<16x8xf32>
    %82 = arith.mulf %81, %81 : vector<16x8xf32>
    %83 = vector.broadcast %7 : vector<1x8xf32> to vector<16x8xf32>
    %84 = arith.mulf %82, %83 : vector<16x8xf32>
    %cst_31 = arith.constant dense<0.000000e+00> : vector<16xf32>
    %85 = vector.multi_reduction <add>, %84, %cst_31 [1] : vector<16x8xf32> to vector<16xf32>
    %86 = vector.shape_cast %85 : vector<16xf32> to vector<16x1xf32>
    %cst_32 = arith.constant 1.250000e-01 : f32
    %87 = vector.broadcast %cst_32 : f32 to vector<16x1xf32>
    %88 = arith.mulf %86, %87 : vector<16x1xf32>
    %cst_33 = arith.constant 9.99999974E-6 : f32
    %89 = vector.broadcast %cst_33 : f32 to vector<16x1xf32>
    %90 = arith.addf %88, %89 : vector<16x1xf32>
    %91 = math.rsqrt %90 : vector<16x1xf32>
    %92 = arith.mulf %72, %91 : vector<16x1xf32>
    %93 = vector.broadcast %92 : vector<16x1xf32> to vector<16x8xf32>
    %94 = arith.mulf %81, %93 : vector<16x8xf32>
    %95 = vector.broadcast %73 : vector<16x1xf32> to vector<16x8xf32>
    %96 = arith.addf %94, %95 : vector<16x8xf32>
    %cst_34 = arith.constant 0.000000e+00 : f32
    %97 = vector.broadcast %cst_34 : f32 to vector<16x8xf32>
    %98 = arith.cmpf oge, %96, %97 : vector<16x8xf32>
    %cst_35 = arith.constant 2.000000e-01 : f32
    %99 = vector.broadcast %cst_35 : f32 to vector<16x8xf32>
    %100 = arith.mulf %99, %96 : vector<16x8xf32>
    %101 = arith.select %98, %96, %100 : vector<16x8xi1>, vector<16x8xf32>
    %c48 = arith.constant 48 : index
    %c0_36 = arith.constant 0 : index
    %102 = vector.load %arg2[%c48, %c0_36] : memref<56x32xf32, #tpu.memory_space<vmem>>, vector<2x16xf32>
    %cst_37 = arith.constant dense<0.000000e+00> : vector<2x8xf32>
    %103 = tpu.matmul %102, %101, %cst_37 {dimension_numbers = #tpu.dot_dimension_numbers<[1], [0], [0], [1], [0, 0, 1, 1], [], []>} : vector<2x16xf32>, vector<16x8xf32>, vector<2x8xf32> -> vector<2x8xf32>
    %c0_38 = arith.constant 0 : index
    %c6 = arith.constant 6 : index
    %104 = vector.load %arg3[%c0_38, %c6] : memref<32x8xf32, #tpu.memory_space<vmem>>, vector<2x1xf32>
    %105 = vector.broadcast %104 : vector<2x1xf32> to vector<2x8xf32>
    %106 = arith.addf %103, %105 : vector<2x8xf32>
    %c0_39 = arith.constant 0 : index
    %c0_40 = arith.constant 0 : index
    %107 = vector.load %arg4[%c0_39, %c0_40] : memref<2x8xf32, #tpu.memory_space<vmem>>, vector<2x8xf32>
    tpu.vector_store %arg4[%c0_39, %c0_40], %106 {strides = array<i32>} : memref<2x8xf32, #tpu.memory_space<vmem>>, vector<2x8xf32>,
    return
  }
}

</mosaic_0001>

<bundles_post_ra>
// kernel: tpu_custom_call.1
= control target key start
LH: loop header
LB: loop body
LE: loop exit
PB: predicated region body
PF: predicated region fallthrough
CT: control target
= control target key end

     0   :  { %9 = vsyncpa [#allocation3], 0  ;;  %s1574_s0 = inlined_call_operand.vmem [shape: f32[8,1080], index: 0, kind: input, shape index: {}]   ;;  %s1575_s1 = inlined_call_operand.hbm [shape: f32[32,1080], index: 1, kind: input, shape index: {}]   ;;  %s1576_s2 = inlined_call_operand.vmem [shape: f32[56,32], index: 2, kind: input, shape index: {}]   ;;  %s1577_s3 = inlined_call_operand.vmem [shape: f32[32,8], index: 3, kind: input, shape index: {}]   ;;  %s1578_s4 = inlined_call_operand.hbm [shape: f32[2,8], index: 4, kind: output, shape index: {}]  }
   0x1   :  { %10 = vsyncpa [#allocation4], 0  ;;  %s1322_s15 = smov [#allocation2]   ;;  %s1274_s19 = scalar_lea.hbm %s1575_s1, 4608 }
   0x2   :  { %s18_s16 = sshll.u32 %s1322_s15, 4  ;;  %p1275_p0 = scmp.ne.s32.totalorder %s1575_s1, %s1274_s19  ;;  %s19_s16 = int_to_ptr.vmem [resolvable:$true] %s18_s16 }
   0x3   :  { %p1278_p1 = scmp.lt.u32.totalorder %s1274_s19, %s1575_s1 }
   0x5   :  { %p1280_p2 = pnand %p1278_p1, %p1275_p0 }
   0x7   :  { %1283 = shalt.err (!%p1280_p2)
}
   0x8   :  { %s1284_s24 = scalar_lea.vmem %s19_s16, 4608  ;;  %p1289_p4 = scmp.lt.s32.totalorder %s19_s16, %s19_s16 }
   0x9   :  { %p1285_p3 = scmp.ne.s32.totalorder %s19_s16, %s1284_s24  ;;  %p1290_p5 = scmp.lt.s32.totalorder %s1284_s24, %s1284_s24 }
   0xb   :  { %p1291_p6 = por %p1290_p5, %p1289_p4 }
   0xd   :  { %p1292_p7 = pnand %p1291_p6, %p1285_p3 }
   0xf   :  { %1295 = shalt.err (!%p1292_p7)
}
  0x10   :  { %s1323_s25 = smov 1152   ;;  %s1324_s26 = smov 72  }
  0x11   :  { %24 = dma.hbm_to_vmem [thread:$0]  %s1575_s1, 4608, %s19_s16, [#allocation3], %s1323_s25, %s1323_s25, %s1324_s26  }
  0x12   :  { %1318 = dma.done.wait [#allocation3], 4608  }
  0x13   :  { %1319 = vsyncadd [#allocation3], 4294962688  ;;  %v69_v0 = vld [vmem:[%s1574_s0 + $0x8] sm:$0xff]  ;;  %v71_v1 = vld [vmem:[%s1574_s0 + $0x18] sm:$0xff]  ;;  %vm77_vm0 = vcmask 457728   ;;  %v518_v51 = vlaneseq  ;;  %v1325_v62 = vmov 0.0  }
  0x14   :  { %v68_v2 = vld [vmem:[%s1574_s0] sm:$0xff]  ;;  %93 = vmatprep.subr.mxu1 %v69_v0  ;;  %178 = vmatprep.subr.mxu0 %v71_v1  ;;  %v70_v3 = vld [vmem:[%s1574_s0 + $0x10] sm:$0xff]  ;;  %v33_v4 = vld [vmem:[#allocation2 + $0x8] sm:$0xff]  ;;  %vm531_vm2 = vcmask 64512   ;;  %vm652_vm3 = vcmask 261120   ;;  %vm1333_vm12 = vmmov 0  }
  0x15   :  { %v35_v5 = vld [vmem:[#allocation2 + $0x18] sm:$0xff]  ;;  %94 = vmatpush1.xpose.msra.mxu1 %v68_v2  ;;  %179 = vmatpush1.xpose.msra.mxu0 %v70_v3  ;;  %v32_v6 = vld [vmem:[#allocation2] sm:$0xff]  ;;  %v34_v7 = vld [vmem:[#allocation2 + $0x10] sm:$0xff]  ;;  %v519_v54 = vand.u32 127, %v518_v51  ;;  %vm1018_vm15 = vcmask 130048   ;;  %s1335_s15 = smov [#allocation5]  }
  0x16   :  { %v73_v8 = vld [vmem:[%s1574_s0 + $0x28] sm:$0xff]  ;;  %157 = vmatprep.mubr.f32.mxu1 %v33_v4  ;;  %242 = vmatprep.mubr.f32.mxu0 %v35_v5  ;;  %v72_v9 = vld [vmem:[%s1574_s0 + $0x20] sm:$0xff]  ;;  %v42_v10 = vld [vmem:[#allocation2 + $0x50] sm:$0xff]  ;;  %s1100_s16 = sshll.u32 %s1335_s15, 4  ;;  %s1101_s16 = int_to_ptr.vmem [resolvable:$true] %s1100_s16 }
  0x17   :  { %263 = vmatprep.subr.mxu0 %v73_v8  ;;  %v44_v11 = vld [vmem:[#allocation2 + $0x60] sm:$0xff]  ;;  %1203 = vmatprep.subr.mxu1 %v71_v1  ;;  %v41_v12 = vld [vmem:[#allocation2 + $0x48] sm:$0xff]  ;;  %v43_v13 = vld [vmem:[#allocation2 + $0x58] sm:$0xff]  ;;  %vm520_vm1 = vcmp.lt.s32.totalorder %v519_v54, 8  ;;  %s1296_s17 = scalar_lea.vmem %s1101_s16, 32  ;;  %p1301_p9 = scmp.lt.s32.totalorder %s1101_s16, %s1101_s16 }
  0x18   :  { %158 = vmatmul.mubr.f32.vlgmr.msra.gmra.mrb[0].mxu1 %v32_v6  ;;  %243 = vmatmul.mubr.f32.vlgmr.msra.gmra.mrb[0].mxu0 %v34_v7  ;;  %v51_v14 = vld [vmem:[#allocation2 + $0x98] sm:$0xff]  ;;  %v53_v15 = vld [vmem:[#allocation2 + $0xa8] sm:$0xff]  ;;  %v50_v17 = vld [vmem:[#allocation2 + $0x90] sm:$0xff]  ;;  %v1407_v63 = vsel %vm520_vm1, 1.0, %v1325_v62  ;;  %p1297_p8 = scmp.ne.s32.totalorder %s1101_s16, %s1296_s17  ;;  %p1302_p10 = scmp.lt.s32.totalorder %s1296_s17, %s1296_s17 }
  0x19   :  { %264 = vmatpush1.xpose.msra.mxu0 %v72_v9  ;;  %162 = vmatprep.mubr.f32.mxu1 %v42_v10  ;;  %v75_v16 = vld [vmem:[%s1574_s0 + $0x38] sm:$0xff]  ;;  %v52_v18 = vld [vmem:[#allocation2 + $0xa0] sm:$0xff]  ;;  %v37_v21 = vld [vmem:[#allocation2 + $0x28] sm:$0xff] }
  0x1a   :  { %247 = vmatprep.mubr.f32.mxu0 %v44_v11  ;;  %1204 = vmatpush1.xpose.msra.mxu1 %v70_v3  ;;  %v76_v19 = vld [vmem:[%s1574_s0 + $0x40] sm:$0xff]  ;;  %v59_v22 = vld [vmem:[#allocation2 + $0xd8] sm:$0xff]  ;;  %v74_v24 = vld [vmem:[%s1574_s0 + $0x30] sm:$0xff]  ;;  %p1303_p11 = por %p1302_p10, %p1301_p9 }
  0x1b   :  { %348 = vmatprep.subr.mxu0 %v75_v16  ;;  %v60_v20 = vld [vmem:[#allocation2 + $0xe0] sm:$0xff]  ;;  %1144 = vmatprep.subr.msk.mxu1 %vm77_vm0, %v76_v19  ;;  %v46_v25 = vld [vmem:[#allocation2 + $0x70] sm:$0xff]  ;;  %v45_v27 = vld [vmem:[#allocation2 + $0x68] sm:$0xff] }
  0x1c   :  { %163 = vmatmul.mubr.f32.gmra.mrb[2].mxu1 %v41_v12  ;;  %248 = vmatmul.mubr.f32.gmra.mrb[2].mxu0 %v43_v13  ;;  %v36_v23 = vld [vmem:[#allocation2 + $0x20] sm:$0xff]  ;;  %v62_v26 = vld [vmem:[#allocation2 + $0xf0] sm:$0xff]  ;;  %v55_v28 = vld [vmem:[#allocation2 + $0xb8] sm:$0xff]  ;;  %p1304_p12 = pnand %p1303_p11, %p1297_p8 }
  0x1d   :  { %167 = vmatprep.mubr.f32.mxu1 %v51_v14  ;;  %252 = vmatprep.mubr.f32.mxu0 %v53_v15  ;;  %v61_v29 = vld [vmem:[#allocation2 + $0xe8] sm:$0xff]  ;;  %v54_v30 = vld [vmem:[#allocation2 + $0xb0] sm:$0xff]  ;;  %v64_v31 = vld [vmem:[#allocation2 + $0x100] sm:$0xff] }
  0x1e   :  { %v40_v32 = vld [vmem:[#allocation2 + $0x40] sm:$0xff]  ;;  %v63_v33 = vld [vmem:[#allocation2 + $0xf8] sm:$0xff]  ;;  %v49_v34 = vld [vmem:[#allocation2 + $0x88] sm:$0xff] }
  0x1f   :  { %v39_v35 = vld [vmem:[#allocation2 + $0x38] sm:$0xff]  ;;  %v58_v36 = vld [vmem:[#allocation2 + $0xd0] sm:$0xff]  ;;  %v48_v39 = vld [vmem:[#allocation2 + $0x80] sm:$0xff] }
  0x20   :  { %168 = vmatmul.mubr.f32.gmra.mrb[4].mxu1 %v50_v17  ;;  %253 = vmatmul.mubr.f32.gmra.mrb[4].mxu0 %v52_v18  ;;  %v38_v37 = vld [vmem:[#allocation2 + $0x30] sm:$0xff]  ;;  %v67_v38 = vld [vmem:[#allocation2 + $0x118] sm:$0xff]  ;;  %v57_v41 = vld [vmem:[#allocation2 + $0xc8] sm:$0xff] }
  0x21   :  { %172 = vmatprep.mubr.f32.mxu1 %v60_v20  ;;  %327 = vmatprep.mubr.f32.mxu0 %v37_v21  ;;  %v47_v40 = vld [vmem:[#allocation2 + $0x78] sm:$0xff]  ;;  %v56_v42 = vld [vmem:[#allocation2 + $0xc0] sm:$0xff]  ;;  %v66_v43 = vld [vmem:[#allocation2 + $0x110] sm:$0xff]  ;;  %v1326_v21 = vmov 1  }
  0x22   :  { %v65_v44 = vld [vmem:[#allocation2 + $0x108] sm:$0xff]  ;;  %1240 = vset.pattern.permute.xlu1 %v1326_v21 }
  0x24   :  { %173 = vmatmul.mubr.f32.gmra.mrb[6].mxu1 %v59_v22  ;;  %328 = vmatmul.mubr.f32.vlgmr.msra.gmra.mrb[0].mxu0 %v36_v23 }
  0x25   :  { %349 = vmatpush1.xpose.msra.mxu0 %v74_v24  ;;  %332 = vmatprep.mubr.f32.mxu0 %v46_v25 }
  0x26   :  { %257 = vmatprep.mubr.f32.mxu1 %v62_v26 }
  0x28   :  { %333 = vmatmul.mubr.f32.gmra.mrb[2].mxu0 %v45_v27 }
  0x29   :  { %337 = vmatprep.mubr.f32.mxu0 %v55_v28 }
  0x2c   :  { %258 = vmatmul.mubr.f32.vlgmr.msra.gmra.mrb[6].mxu1 %v61_v29  ;;  %338 = vmatmul.mubr.f32.gmra.mrb[4].mxu0 %v54_v30 }
  0x2d   :  { %342 = vmatprep.mubr.f32.mxu0 %v64_v31  ;;  %1145 = vmatpush3.xpose.msk.msra.mxu1 %vm77_vm0, %v76_v19 }
  0x2e   :  { %1146 = vmatprep.mubr.msk.f32.mxu1 %vm77_vm0, %v40_v32 }
  0x30   :  { %343 = vmatmul.mubr.f32.gmra.mrb[6].mxu0 %v63_v33  ;;  %1147 = vmatmul.mubr.msk.f32.vlgmr.msra.gmra.mrb[8].mxu1 %vm77_vm0, %v49_v34 }
  0x31   :  { %412 = vmatprep.mubr.f32.mxu0 %v39_v35  ;;  %1149 = vmatprep.mubr.msk.f32.mxu1 %vm77_vm0, %v58_v36 }
  0x34   :  { %413 = vmatmul.mubr.f32.vlgmr.msra.gmra.mrb[0].mxu0 %v38_v37  ;;  %1150 = vmatmul.mubr.msk.f32.gmra.mrb[10].mxu1 %vm77_vm0, %v67_v38  ;;  %vm1092_vm0 = vcmask 58368  }
  0x35   :  { %417 = vmatprep.mubr.f32.mxu0 %v48_v39 }
  0x38   :  { %418 = vmatmul.mubr.f32.gmra.mrb[2].mxu0 %v47_v40 }
  0x39   :  { %422 = vmatprep.mubr.f32.mxu0 %v57_v41 }
  0x3c   :  { %423 = vmatmul.mubr.f32.gmra.mrb[4].mxu0 %v56_v42 }
  0x3d   :  { %427 = vmatprep.mubr.f32.mxu0 %v66_v43 }
  0x40   :  { %428 = vmatmul.mubr.f32.gmra.mrb[6].mxu0 %v65_v44 }
  0xeb   :  { %v159_v45 = vpop.f32.mrb[0].mxu1 }
  0xec   :  { %v161_v46 = vpop.f32.mrb[1].mxu1 }
  0xed   :  { %v1445_v46 = vld [vmem:[%s1577_s3] sm:$0xff] }
  0xef   :  { %v164_v47 = vpop.f32.mrb[2].mxu1 }
  0xf0   :  { %v166_v48 = vpop.f32.mrb[3].mxu1 }
  0xf1   :  { %v1327_v48 = vmov 0  }
  0xf2   :  { %1239 = vset.pattern.permute.xlu0 %v1327_v48 }
  0xf3   :  { %v169_v49 = vpop.f32.mrb[4].mxu1 }
  0xf4   :  { %v171_v50 = vpop.f32.mrb[5].mxu1 }
  0xff   :  { %v259_v52 = vpop.f32.mrb[6].mxu1 }
 0x100   :  { %v261_v53 = vpop.f32.mrb[7].mxu1 }
 0x103   :  { %v1148_v55 = vpop.f32.mrb[8].mxu1 }
 0x104   :  { %v499_v56 = vpop.f32.mrb[9].mxu1 }
 0x107   :  { %v414_v57 = vpop.f32.mrb[0].mxu0  ;;  %v1151_v58 = vpop.f32.mrb[10].mxu1 }
 0x108   :  { %v1205_v59 = vadd.f32 %v414_v57, %v159_v45  ;;  %v416_v60 = vpop.f32.mrb[1].mxu0  ;;  %v509_v61 = vpop.f32.mrb[11].mxu1 }
 0x10a   :  { %v500_v0 = vadd.f32 %v1205_v59, %v499_v56 }
 0x10b   :  { %v419_v1 = vpop.f32.mrb[2].mxu0 }
 0x10c   :  { %v1206_v2 = vadd.f32 %v419_v1, %v164_v47  ;;  %v421_v3 = vpop.f32.mrb[3].mxu0  ;;  %v527_v4 = vmul.f32 %v1407_v63, %v500_v0  ;;  %v1451_v47 = vld [vmem:[%s1577_s3 + $0x8] sm:$0xff] }
 0x10e   :  { %v505_v5 = vadd.f32 %v1206_v2, %v1148_v55  ;;  %v532_v6 = vsel %vm531_vm2, %v527_v4, 0.0 }
 0x10f   :  { %v424_v7 = vpop.f32.mrb[4].mxu0  ;;  %533 = vadd.xlane.f32.xlu0 %v532_v6  ;;  %v1466_v6 = vld [vmem:[%s1577_s3 + $0x18] sm:$0xff] }
 0x110   :  { %v1207_v8 = vadd.f32 %v424_v7, %v169_v49  ;;  %v426_v9 = vpop.f32.mrb[5].mxu0  ;;  %v528_v10 = vmul.f32 %v1407_v63, %v505_v5  ;;  %v1457_v49 = vld [vmem:[%s1577_s3 + $0x10] sm:$0xff] }
 0x111   :  { %v648_v9 = vld [vmem:[%s1576_s2] sm:$0xff] }
 0x112   :  { %v510_v11 = vadd.f32 %v1207_v8, %v509_v61  ;;  %v535_v12 = vsel %vm531_vm2, %v528_v10, 0.0  ;;  %1160 = vmatprep.mubr.msk.f32.mxu1 %vm652_vm3, %v648_v9 }
 0x113   :  { %v429_v13 = vpop.f32.mrb[6].mxu0  ;;  %536 = vadd.xlane.f32.xlu0 %v535_v12 }
 0x114   :  { %v1208_v14 = vadd.f32 %v429_v13, %v259_v52  ;;  %v431_v15 = vpop.f32.mrb[7].mxu0  ;;  %v529_v16 = vmul.f32 %v1407_v63, %v510_v11 }
 0x116   :  { %v515_v17 = vadd.f32 %v1208_v14, %v1151_v58  ;;  %v538_v18 = vsel %vm531_vm2, %v529_v16, 0.0 }
 0x117   :  { %539 = vadd.xlane.f32.xlu1 %v538_v18 }
 0x118   :  { %v530_v19 = vmul.f32 %v1407_v63, %v515_v17 }
 0x11a   :  { %v541_v20 = vsel %vm531_vm2, %v530_v19, 0.0 }
 0x11b   :  { %542 = vadd.xlane.f32.xlu1 %v541_v20 }
 0x19c   :  { %v534_v22 = vpop.xlane.xlu0 %533 }
 0x19d   :  { %v544_v23 = vmul.f32 0.125, %v534_v22 }
 0x19f   :  { %v1418_v24 = vsub.f32 %v500_v0, %v544_v23 }
 0x1a0   :  { %v537_v25 = vpop.xlane.xlu0 %536 }
 0x1a1   :  { %v545_v26 = vmul.f32 0.125, %v537_v25  ;;  %v552_v27 = vmul.f32 %v1418_v24, %v1418_v24 }
 0x1a3   :  { %v1422_v28 = vsub.f32 %v505_v5, %v545_v26  ;;  %v556_v29 = vmul.f32 %v1407_v63, %v552_v27 }
 0x1a4   :  { %v540_v30 = vpop.xlane.xlu1 %539 }
 0x1a5   :  { %v546_v31 = vmul.f32 0.125, %v540_v30  ;;  %v560_v32 = vsel %vm531_vm2, %v556_v29, 0.0  ;;  %v553_v33 = vmul.f32 %v1422_v28, %v1422_v28 }
 0x1a6   :  { %561 = vadd.xlane.f32.xlu0 %v560_v32 }
 0x1a7   :  { %v1428_v34 = vsub.f32 %v510_v11, %v546_v31  ;;  %v557_v35 = vmul.f32 %v1407_v63, %v553_v33 }
 0x1a8   :  { %v543_v36 = vpop.xlane.xlu1 %542 }
 0x1a9   :  { %v547_v37 = vmul.f32 0.125, %v543_v36  ;;  %v563_v38 = vsel %vm531_vm2, %v557_v35, 0.0  ;;  %v554_v39 = vmul.f32 %v1428_v34, %v1428_v34 }
 0x1aa   :  { %564 = vadd.xlane.f32.xlu1 %v563_v38  ;;  %v651_v38 = vld [vmem:[%s1576_s2 + $0x18] sm:$0xff] }
 0x1ab   :  { %v1434_v40 = vsub.f32 %v515_v17, %v547_v37  ;;  %v558_v41 = vmul.f32 %v1407_v63, %v554_v39  ;;  %v650_v37 = vld [vmem:[%s1576_s2 + $0x10] sm:$0xff] }
 0x1ad   :  { %v566_v42 = vsel %vm531_vm2, %v558_v41, 0.0  ;;  %v555_v43 = vmul.f32 %v1434_v40, %v1434_v40 }
 0x1ae   :  { %567 = vadd.xlane.f32.xlu0 %v566_v42 }
 0x1af   :  { %v559_v44 = vmul.f32 %v1407_v63, %v555_v43 }
 0x1b1   :  { %v569_v45 = vsel %vm531_vm2, %v559_v44, 0.0 }
 0x1b2   :  { %570 = vadd.xlane.f32.xlu1 %v569_v45 }
 0x1c3   :  { %614 = vperm.xlu1 %1240, %v1445_v46  }
 0x1c7   :  { %619 = vperm.xlu1 %1240, %v1451_v47  }
 0x1cb   :  { %624 = vperm.xlu1 %1240, %v1457_v49  }
 0x1cf   :  { %1241 = vset.pattern.permute.xlu1 %v1327_v48 }
 0x233   :  { %v562_v50 = vpop.xlane.xlu0 %561 }
 0x234   :  { %v572_v51 = vmul.f32 0.125, %v562_v50 }
 0x236   :  { %v576_v52 = vadd.f32 1e-05, %v572_v51 }
 0x237   :  { %v565_v53 = vpop.xlane.xlu1 %564 }
 0x238   :  { %1254 = vrsqrt.f32 %v576_v52  ;;  %v573_v54 = vmul.f32 0.125, %v565_v53 }
 0x23a   :  { %v577_v55 = vadd.f32 1e-05, %v573_v54 }
 0x23b   :  { %v568_v56 = vpop.xlane.xlu0 %567 }
 0x23c   :  { %1256 = vrsqrt.f32 %v577_v55  ;;  %v574_v57 = vmul.f32 0.125, %v568_v56 }
 0x23e   :  { %v578_v58 = vadd.f32 1e-05, %v574_v57 }
 0x23f   :  { %v571_v59 = vpop.xlane.xlu1 %570 }
 0x240   :  { %1258 = vrsqrt.f32 %v578_v58  ;;  %v575_v60 = vmul.f32 0.125, %v571_v59 }
 0x242   :  { %v1255_v61 = vpop.eup %1254  ;;  %v579_v0 = vadd.f32 1e-05, %v575_v60 }
 0x243   :  { %v584_v1 = vmul.f32 %v1255_v61, %v1445_v46  ;;  %v615_v10 = vpop.permute.xlu1 %614 }
 0x244   :  { %1260 = vrsqrt.f32 %v579_v0 }
 0x245   :  { %590 = vperm.xlu0 %1239, %v584_v1  }
 0x246   :  { %v1257_v2 = vpop.eup %1256 }
 0x247   :  { %v585_v3 = vmul.f32 %v1257_v2, %v1451_v47  ;;  %v620_v11 = vpop.permute.xlu1 %619 }
 0x249   :  { %595 = vperm.xlu1 %1241, %v585_v3  }
 0x24a   :  { %v1259_v4 = vpop.eup %1258 }
 0x24b   :  { %v586_v5 = vmul.f32 %v1259_v4, %v1457_v49  ;;  %v625_v12 = vpop.permute.xlu1 %624 }
 0x24d   :  { %600 = vperm.xlu1 %1241, %v586_v5  }
 0x24e   :  { %v1261_v7 = vpop.eup %1260 }
 0x24f   :  { %v587_v8 = vmul.f32 %v1261_v7, %v1466_v6 }
 0x251   :  { %605 = vperm.xlu1 %1241, %v587_v8  }
 0x255   :  { %1242 = vset.pattern.permute.xlu1 %v1326_v21 }
 0x256   :  { %629 = vperm.xlu1 %1242, %v1466_v6  }
 0x2c4   :  { %v591_v13 = vpop.permute.xlu0 %590 }
 0x2c5   :  { %v608_v14 = vmul.f32 %v591_v13, %v1418_v24 }
 0x2c7   :  { %v632_v15 = vadd.f32 %v615_v10, %v608_v14 }
 0x2c8   :  { %v596_v16 = vpop.permute.xlu1 %595 }
 0x2c9   :  { %v609_v17 = vmul.f32 %v596_v16, %v1422_v28  ;;  %v640_v18 = vmul.f32 0.2, %v632_v15  ;;  %vm636_vm4 = vcmp.ge.f32.partialorder %v632_v15, 0.0 }
 0x2cb   :  { %v633_v19 = vadd.f32 %v620_v11, %v609_v17  ;;  %v644_v23 = vsel %vm636_vm4, %v632_v15, %v640_v18  ;;  %v1328_v17 = vmov 2  }
 0x2cc   :  { %v601_v20 = vpop.permute.xlu1 %600  ;;  %1244 = vset.pattern.permute.xlu1 %v1328_v17  ;;  %1243 = vset.pattern.permute.xlu0 %v1328_v17 }
 0x2cd   :  { %vm637_vm5 = vcmp.ge.f32.partialorder %v633_v19, 0.0  ;;  %v641_v21 = vmul.f32 0.2, %v633_v19  ;;  %v610_v22 = vmul.f32 %v601_v20, %v1428_v34  ;;  %v649_v34 = vld [vmem:[%s1576_s2 + $0x8] sm:$0xff] }
 0x2cf   :  { %v645_v25 = vsel %vm637_vm5, %v633_v19, %v641_v21  ;;  %v634_v29 = vadd.f32 %v625_v12, %v610_v22 }
 0x2d0   :  { %v606_v26 = vpop.permute.xlu1 %605  ;;  %v1184_v27 = vpack.c.bf16 %v645_v25, %v644_v23 }
 0x2d1   :  { %v611_v24 = vmul.f32 %v606_v26, %v1434_v40  ;;  %v642_v31 = vmul.f32 0.2, %v634_v29  ;;  %vm638_vm6 = vcmp.ge.f32.partialorder %v634_v29, 0.0 }
 0x2d2   :  { %1185 = vmatprep.subr.bf16.mxu1 %v1184_v27 }
 0x2d3   :  { %1187 = vmatpush3.bf16.msra.mxu1 %v1184_v27  ;;  %v646_v33 = vsel %vm638_vm6, %v634_v29, %v642_v31 }
 0x2d5   :  { %v630_v30 = vpop.permute.xlu1 %629 }
 0x2d6   :  { %v635_v28 = vadd.f32 %v630_v30, %v611_v24 }
 0x2d8   :  { %vm639_vm7 = vcmp.ge.f32.partialorder %v635_v28, 0.0  ;;  %v643_v32 = vmul.f32 0.2, %v635_v28 }
 0x2da   :  { %v647_v35 = vsel %vm639_vm7, %v635_v28, %v643_v32 }
 0x2db   :  { %v1188_v36 = vpack.c.bf16 %v647_v35, %v646_v33  ;;  %v1329_v35 = vmov 3  }
 0x2dd   :  { %1189 = vmatprep.subr.bf16.mxu1 %v1188_v36 }
 0x2de   :  { %1191 = vmatpush3.bf16.msra.mxu1 %v1188_v36 }
 0x2e1   :  { %1161 = vmatmul.mubr.msk.f32.vlgmr.msra.gmra.mrb[12].mxu1 %vm652_vm3, %v649_v34 }
 0x2e2   :  { %1163 = vmatprep.mubr.msk.f32.mxu1 %vm652_vm3, %v650_v37 }
 0x2e5   :  { %1164 = vmatmul.mubr.msk.f32.gmra.mrb[14].mxu1 %vm652_vm3, %v651_v38 }
 0x3b4   :  { %v1162_v39 = vpop.f32.mrb[12].mxu1 }
 0x3b5   :  { %v751_v40 = vmul.f32 %v1162_v39, %v1407_v63  ;;  %v731_v41 = vpop.f32.mrb[13].mxu1 }
 0x3b6   :  { %v750_v42 = vmul.f32 %v1407_v63, %v731_v41 }
 0x3b7   :  { %v757_v43 = vsel %vm531_vm2, %v751_v40, 0.0 }
 0x3b8   :  { %758 = vadd.xlane.f32.xlu0 %v757_v43  ;;  %v1165_v44 = vpop.f32.mrb[14].mxu1  ;;  %v754_v45 = vsel %vm531_vm2, %v750_v42, 0.0 }
 0x3b9   :  { %v753_v48 = vmul.f32 %v1165_v44, %v1407_v63  ;;  %755 = vadd.xlane.f32.xlu1 %v754_v45  ;;  %v741_v50 = vpop.f32.mrb[15].mxu1 }
 0x3ba   :  { %v752_v51 = vmul.f32 %v1407_v63, %v741_v50 }
 0x3bb   :  { %v763_v52 = vsel %vm531_vm2, %v753_v48, 0.0 }
 0x3bc   :  { %v760_v53 = vsel %vm531_vm2, %v752_v51, 0.0 }
 0x3bd   :  { %764 = vadd.xlane.f32.xlu1 %v763_v52  ;;  %761 = vadd.xlane.f32.xlu0 %v760_v53 }
 0x445   :  { %v759_v54 = vpop.xlane.xlu0 %758 }
 0x446   :  { %v767_v55 = vmul.f32 0.125, %v759_v54  ;;  %v756_v56 = vpop.xlane.xlu1 %755 }
 0x447   :  { %v766_v57 = vmul.f32 0.125, %v756_v56 }
 0x448   :  { %v1499_v58 = vsub.f32 %v1162_v39, %v767_v55  ;;  %v866_v39 = vld [vmem:[%s1576_s2 + $0x20] sm:$0xff] }
 0x449   :  { %v1501_v59 = vsub.f32 %v731_v41, %v766_v57  ;;  %1174 = vmatprep.mubr.msk.f32.mxu1 %vm652_vm3, %v866_v39 }
 0x44a   :  { %v765_v60 = vpop.xlane.xlu1 %764  ;;  %v762_v61 = vpop.xlane.xlu0 %761  ;;  %v775_v0 = vmul.f32 %v1499_v58, %v1499_v58 }
 0x44b   :  { %v769_v1 = vmul.f32 0.125, %v765_v60  ;;  %v768_v2 = vmul.f32 0.125, %v762_v61  ;;  %v774_v3 = vmul.f32 %v1501_v59, %v1501_v59 }
 0x44c   :  { %v779_v4 = vmul.f32 %v1407_v63, %v775_v0 }
 0x44d   :  { %v1508_v5 = vsub.f32 %v1165_v44, %v769_v1  ;;  %v1510_v7 = vsub.f32 %v741_v50, %v768_v2  ;;  %v778_v8 = vmul.f32 %v1407_v63, %v774_v3 }
 0x44e   :  { %v785_v9 = vsel %vm531_vm2, %v779_v4, 0.0 }
 0x44f   :  { %786 = vadd.xlane.f32.xlu1 %v785_v9  ;;  %v782_v10 = vsel %vm531_vm2, %v778_v8, 0.0  ;;  %v777_v11 = vmul.f32 %v1508_v5, %v1508_v5  ;;  %v776_v12 = vmul.f32 %v1510_v7, %v1510_v7  ;;  %v867_v8 = vld [vmem:[%s1576_s2 + $0x28] sm:$0xff] }
 0x450   :  { %783 = vadd.xlane.f32.xlu0 %v782_v10 }
 0x451   :  { %v781_v13 = vmul.f32 %v1407_v63, %v777_v11  ;;  %v780_v14 = vmul.f32 %v1407_v63, %v776_v12 }
 0x453   :  { %v791_v15 = vsel %vm531_vm2, %v781_v13, 0.0  ;;  %v788_v16 = vsel %vm531_vm2, %v780_v14, 0.0 }
 0x454   :  { %792 = vadd.xlane.f32.xlu1 %v791_v15  ;;  %789 = vadd.xlane.f32.xlu0 %v788_v16 }
 0x4dc   :  { %v787_v18 = vpop.xlane.xlu1 %786 }
 0x4dd   :  { %v795_v19 = vmul.f32 0.125, %v787_v18  ;;  %v784_v20 = vpop.xlane.xlu0 %783 }
 0x4de   :  { %v794_v21 = vmul.f32 0.125, %v784_v20 }
 0x4df   :  { %v799_v22 = vadd.f32 1e-05, %v795_v19 }
 0x4e0   :  { %v798_v23 = vadd.f32 1e-05, %v794_v21 }
 0x4e1   :  { %1262 = vrsqrt.f32 %v799_v22  ;;  %v793_v25 = vpop.xlane.xlu1 %792  ;;  %v790_v27 = vpop.xlane.xlu0 %789 }
 0x4e2   :  { %1264 = vrsqrt.f32 %v798_v23  ;;  %v797_v26 = vmul.f32 0.125, %v793_v25  ;;  %v796_v28 = vmul.f32 0.125, %v790_v27  ;;  %v1331_v27 = vmov 4  }
 0x4e4   :  { %v801_v31 = vadd.f32 1e-05, %v797_v26  ;;  %v800_v33 = vadd.f32 1e-05, %v796_v28  ;;  %v1330_v26 = vmov 5  }
 0x4e6   :  { %1266 = vrsqrt.f32 %v801_v31 }
 0x4e7   :  { %1268 = vrsqrt.f32 %v800_v33 }
 0x4eb   :  { %v1263_v29 = vpop.eup %1262 }
 0x4ec   :  { %v1265_v24 = vpop.eup %1264  ;;  %v807_v30 = vmul.f32 %v1263_v29, %v1451_v47 }
 0x4ed   :  { %v806_v32 = vmul.f32 %v1265_v24, %v1445_v46 }
 0x4ee   :  { %817 = vperm.xlu1 %1244, %v807_v30  }
 0x4ef   :  { %812 = vperm.xlu0 %1243, %v806_v32  }
 0x4f0   :  { %v1267_v36 = vpop.eup %1266 }
 0x4f1   :  { %v809_v34 = vmul.f32 %v1267_v36, %v1466_v6  ;;  %v1269_v37 = vpop.eup %1268 }
 0x4f2   :  { %1245 = vset.pattern.permute.xlu1 %v1329_v35  ;;  %v808_v38 = vmul.f32 %v1269_v37, %v1457_v49  ;;  %v1012_v37 = vld [vmem:[%s1577_s3] sm:$0x3] }
 0x4f3   :  { %835 = vperm.xlu1 %1245, %v1445_v46   ;;  %1248 = vset.pattern.permute.xlu0 %v1331_v27 }
 0x4f7   :  { %839 = vperm.xlu1 %1245, %v1451_v47  }
 0x4fb   :  { %843 = vperm.xlu1 %1245, %v1457_v49  }
 0x4ff   :  { %1246 = vset.pattern.permute.xlu1 %v1328_v17 }
 0x500   :  { %827 = vperm.xlu1 %1246, %v809_v34   ;;  %v1332_v34 = vmov 0.0|0.0  }
 0x504   :  { %822 = vperm.xlu1 %1246, %v808_v38   ;;  %v1334_v38 = vmov 6  }
 0x508   :  { %1247 = vset.pattern.permute.xlu1 %v1329_v35 }
 0x509   :  { %847 = vperm.xlu1 %1247, %v1466_v6  }
 0x50d   :  { %1249 = vset.pattern.permute.xlu1 %v1330_v26 }
 0x56d   :  { %v818_v40 = vpop.permute.xlu1 %817 }
 0x56e   :  { %v813_v41 = vpop.permute.xlu0 %812  ;;  %v831_v45 = vmul.f32 %v818_v40, %v1499_v58 }
 0x56f   :  { %v830_v42 = vmul.f32 %v813_v41, %v1501_v59 }
 0x572   :  { %v836_v43 = vpop.permute.xlu1 %835 }
 0x573   :  { %v850_v44 = vadd.f32 %v836_v43, %v830_v42 }
 0x575   :  { %v858_v49 = vmul.f32 0.2, %v850_v44  ;;  %vm854_vm8 = vcmp.ge.f32.partialorder %v850_v44, 0.0 }
 0x576   :  { %v840_v48 = vpop.permute.xlu1 %839 }
 0x577   :  { %v851_v50 = vadd.f32 %v840_v48, %v831_v45  ;;  %v862_v52 = vsel %vm854_vm8, %v850_v44, %v858_v49 }
 0x579   :  { %vm855_vm9 = vcmp.ge.f32.partialorder %v851_v50, 0.0  ;;  %v859_v6 = vmul.f32 0.2, %v851_v50 }
 0x57a   :  { %v844_v51 = vpop.permute.xlu1 %843 }
 0x57b   :  { %v863_v53 = vsel %vm855_vm9, %v851_v50, %v859_v6  ;;  %v1011_v6 = vld [vmem:[%s1576_s2 + $0x30] sm:$0x3] }
 0x57c   :  { %v1192_v54 = vpack.c.bf16 %v863_v53, %v862_v52 }
 0x57e   :  { %1193 = vmatprep.subr.bf16.mxu1 %v1192_v54 }
 0x57f   :  { %v828_v55 = vpop.permute.xlu1 %827  ;;  %1195 = vmatpush3.bf16.msra.mxu1 %v1192_v54 }
 0x580   :  { %v833_v60 = vmul.f32 %v828_v55, %v1508_v5 }
 0x583   :  { %v823_v56 = vpop.permute.xlu1 %822 }
 0x584   :  { %v832_v57 = vmul.f32 %v823_v56, %v1510_v7 }
 0x586   :  { %v852_v59 = vadd.f32 %v844_v51, %v832_v57 }
 0x588   :  { %v848_v58 = vpop.permute.xlu1 %847  ;;  %v860_v61 = vmul.f32 0.2, %v852_v59  ;;  %vm856_vm10 = vcmp.ge.f32.partialorder %v852_v59, 0.0 }
 0x589   :  { %v853_v0 = vadd.f32 %v848_v58, %v833_v60 }
 0x58a   :  { %v864_v2 = vsel %vm856_vm10, %v852_v59, %v860_v61 }
 0x58b   :  { %vm857_vm11 = vcmp.ge.f32.partialorder %v853_v0, 0.0  ;;  %v861_v1 = vmul.f32 0.2, %v853_v0 }
 0x58d   :  { %v865_v3 = vsel %vm857_vm11, %v853_v0, %v861_v1 }
 0x58e   :  { %v1196_v4 = vpack.c.bf16 %v865_v3, %v864_v2 }
 0x590   :  { %1197 = vmatprep.subr.bf16.mxu1 %v1196_v4 }
 0x591   :  { %1199 = vmatpush3.bf16.msra.mxu1 %v1196_v4 }
 0x592   :  { %1200 = vmatprep.subr.bf16.mxu1 %v1332_v34 }
 0x594   :  { %1175 = vmatmul.mubr.msk.f32.vlgmr.msra.gmra.mrb[16].mxu1 %vm652_vm3, %v867_v8 }
 0x595   :  { %1181 = vmatprep.mubr.msk.f32.mxu1 %vm1333_vm12, %v1325_v62 }
 0x667   :  { %v1176_v7 = vpop.f32.mrb[16].mxu1 }
 0x668   :  { %v952_v5 = vmul.f32 %v1176_v7, %v1407_v63  ;;  %v940_v9 = vpop.f32.mrb[17].mxu1 }
 0x669   :  { %v951_v10 = vmul.f32 %v1407_v63, %v940_v9 }
 0x66a   :  { %v956_v11 = vsel %vm531_vm2, %v952_v5, 0.0 }
 0x66b   :  { %957 = vadd.xlane.f32.xlu0 %v956_v11  ;;  %v953_v12 = vsel %vm531_vm2, %v951_v10, 0.0 }
 0x66c   :  { %954 = vadd.xlane.f32.xlu1 %v953_v12 }
 0x67d   :  { %995 = vperm.xlu1 %1249, %v1445_v46  }
 0x681   :  { %1250 = vset.pattern.permute.xlu1 %v1331_v27 }
 0x6f8   :  { %v958_v13 = vpop.xlane.xlu0 %957 }
 0x6f9   :  { %v960_v14 = vmul.f32 0.125, %v958_v13  ;;  %v955_v15 = vpop.xlane.xlu1 %954 }
 0x6fa   :  { %v959_v16 = vmul.f32 0.125, %v955_v15 }
 0x6fb   :  { %v962_v17 = vsub.f32 %v1176_v7, %v960_v14 }
 0x6fc   :  { %v961_v18 = vsub.f32 %v940_v9, %v959_v16 }
 0x6fd   :  { %v964_v20 = vmul.f32 %v962_v17, %v962_v17 }
 0x6fe   :  { %v963_v19 = vmul.f32 %v961_v18, %v961_v18 }
 0x6ff   :  { %v966_v23 = vmul.f32 %v1407_v63, %v964_v20 }
 0x700   :  { %v965_v21 = vmul.f32 %v1407_v63, %v963_v19 }
 0x701   :  { %v970_v25 = vsel %vm531_vm2, %v966_v23, 0.0 }
 0x702   :  { %v967_v22 = vsel %vm531_vm2, %v965_v21, 0.0 }
 0x703   :  { %968 = vadd.xlane.f32.xlu0 %v967_v22 }
 0x707   :  { %971 = vadd.xlane.f32.xlu0 %v970_v25 }
 0x790   :  { %v969_v29 = vpop.xlane.xlu0 %968 }
 0x791   :  { %v973_v24 = vmul.f32 0.125, %v969_v29 }
 0x793   :  { %v975_v30 = vadd.f32 1e-05, %v973_v24 }
 0x794   :  { %v972_v31 = vpop.xlane.xlu0 %971 }
 0x795   :  { %1270 = vrsqrt.f32 %v975_v30  ;;  %v974_v28 = vmul.f32 0.125, %v972_v31 }
 0x797   :  { %v976_v32 = vadd.f32 1e-05, %v974_v28 }
 0x799   :  { %1272 = vrsqrt.f32 %v976_v32 }
 0x79f   :  { %v1271_v63 = vpop.eup %1270 }
 0x7a0   :  { %v979_v33 = vmul.f32 %v1271_v63, %v1445_v46  ;;  %v996_v46 = vpop.permute.xlu1 %995 }
 0x7a2   :  { %983 = vperm.xlu1 %1250, %v979_v33  }
 0x7a3   :  { %v1273_v35 = vpop.eup %1272 }
 0x7a4   :  { %v980_v36 = vmul.f32 %v1273_v35, %v1451_v47 }
 0x7a6   :  { %988 = vperm.xlu0 %1248, %v980_v36   ;;  %1251 = vset.pattern.permute.xlu1 %v1330_v26 }
 0x7a7   :  { %1000 = vperm.xlu1 %1251, %v1451_v47  }
 0x7aa   :  { %1253 = vset.pattern.permute.xlu0 %v1334_v38 }
 0x7ab   :  { %1252 = vset.pattern.permute.xlu1 %v1334_v38 }
 0x7ac   :  { %1015 = vperm.xlu1 %1252, %v1012_v37  }
 0x821   :  { %v984_v39 = vpop.permute.xlu1 %983 }
 0x822   :  { %v991_v40 = vmul.f32 %v984_v39, %v961_v18 }
 0x824   :  { %v1003_v41 = vadd.f32 %v996_v46, %v991_v40 }
 0x825   :  { %v989_v42 = vpop.permute.xlu0 %988 }
 0x826   :  { %v992_v43 = vmul.f32 %v989_v42, %v962_v17  ;;  %v1001_v47 = vpop.permute.xlu1 %1000  ;;  %v1007_v44 = vmul.f32 0.2, %v1003_v41  ;;  %vm1005_vm13 = vcmp.ge.f32.partialorder %v1003_v41, 0.0 }
 0x828   :  { %v1004_v45 = vadd.f32 %v1001_v47, %v992_v43  ;;  %v1009_v48 = vsel %vm1005_vm13, %v1003_v41, %v1007_v44 }
 0x82a   :  { %vm1006_vm14 = vcmp.ge.f32.partialorder %v1004_v45, 0.0  ;;  %v1008_v62 = vmul.f32 0.2, %v1004_v45 }
 0x82b   :  { %v1016_v51 = vpop.permute.xlu1 %1015 }
 0x82c   :  { %v1010_v49 = vsel %vm1006_vm14, %v1004_v45, %v1008_v62 }
 0x82d   :  { %v1201_v50 = vpack.c.bf16 %v1010_v49, %v1009_v48 }
 0x82f   :  { %1202 = vmatpush3.bf16.msra.mxu1 %v1201_v50 }
 0x832   :  { %1182 = vmatmul.mubr.msk.f32.vlgmr.msra.gmra.mrb[18].mxu1 %vm1018_vm15, %v1011_v6 }
 0x905   :  { %v1088_v52 = vpop.f32.mrb[18].mxu1 }
 0x906   :  { %v1183_v53 = vpop.f32.mrb[19].mxu1  ;;  %v1089_v54 = vadd.f32 %v1088_v52, %v1016_v51 }
 0x908   :  { %1093 = vst.msk [vmem:[#allocation5] sm:$0x3] %vm1092_vm0, %v1089_v54 }
 0x909   :  { %1307 = shalt.err (!%p1304_p12)
}
 0x90a   :  { %s1308_s19 = scalar_lea.hbm %s1578_s4, 32 }
 0x90b   :  { %p1309_p13 = scmp.ne.s32.totalorder %s1578_s4, %s1308_s19  ;;  %p1312_p0 = scmp.lt.u32.totalorder %s1308_s19, %s1578_s4 }
 0x90d   :  { %p1314_p1 = pnand %p1312_p0, %p1309_p13 }
 0x90f   :  { %1317 = shalt.err (!%p1314_p1)
}
 0x910   :  { %1103 = dma.vmem_to_hbm [thread:$0]  %s1101_s16, 32, %s1578_s4, [#allocation4]  }
 0x911   :  { %1320 = dma.done.wait [#allocation4], 32  }
 0x912   :  { %1321 = vsyncadd [#allocation4], 4294967264 }
 0x913   :  { %1107 = vsyncpa [#allocation3], 1 }
 0x914   :  { %1108 = vsyncpa [#allocation4], 1 }

</bundles_post_ra>
